<compile_context>
chip_gen: v5e
topology: v5e:2x2
jax: 0.10.0
libtpu: 0.0.40
codegen_flags: <defaults>
</compile_context>

<pallas_src>
import math

import jax
import jax.numpy as jnp
from jax.experimental import pallas as pl
from jax.experimental.pallas import tpu as pltpu

_EPS = 1e-5


def _layernorm_kernel(x_ref, w_ref, b_ref, o_ref):
    # x_ref: (TILE_R, C) block in VMEM; w_ref / b_ref: (1, C) resident params.
    # NOTE: rows are fully independent; the garbage rows of a masked partial
    # last block are computed but their OOB stores are dropped by Pallas.
    # Do NOT add any cross-row reduction here without changing the grid.
    x = x_ref[...].astype(jnp.float32)
    mu = jnp.mean(x, axis=-1, keepdims=True)
    d = x - mu
    # Two-pass variance: matches torch.var(unbiased=False) without the
    # E[x^2]-mu^2 cancellation problem; extra VPU work is hidden (HBM-bound).
    var = jnp.mean(d * d, axis=-1, keepdims=True)
    inv = jax.lax.rsqrt(var + _EPS)
    y = d * inv * w_ref[...].astype(jnp.float32) + b_ref[...].astype(jnp.float32)
    o_ref[...] = y.astype(o_ref.dtype)


def _vmem_capacity_bytes():
    try:
        info = pltpu.get_tpu_info()
        cap = getattr(info, "vmem_capacity_bytes", None)
        if cap:
            return int(cap)
    except Exception:
        pass
    return 64 << 20  # conservative default (v7x-sized VMEM)


def _pick_tile_rows(r, c, itemsize, vmem_cap):
    """Row-tile size for the (R, C) layernorm. Returns None -> use XLA fallback."""
    small_vmem = vmem_cap <= (64 << 20)  # v7x-class: 64 MiB per TensorCore

    # Per-row VMEM bytes: double-buffered input + double-buffered output
    # (4 * itemsize) plus ~2 live f32 temporaries inside the kernel (8 B).
    per_row_bytes = (4 * itemsize + 8) * c

    # Total buffer budget, generation-aware; leaves headroom under the cap.
    budget = (28 << 20) if small_vmem else (64 << 20)

    # Sublane packing for the dtype: f32 -> 8, bf16 -> 16, int8/fp8 -> 32.
    sub = max(8, 32 // itemsize)

    max_rows_vmem = budget // per_row_bytes
    if max_rows_vmem < sub:
        return None  # C so large even a minimal tile blows the budget

    # Bytes-based per-step target: keep the ~0.35 us/step fixed overhead at
    # <~10% of HBM time. v7x's ~3.2 TB/s HBM needs ~2x larger blocks than
    # v5e/v6e to hit the same percentage.
    target_block_bytes = (8 << 20) if small_vmem else (4 << 20)
    target_rows = max(sub, target_block_bytes // (c * itemsize))

    tile = min(target_rows, max_rows_vmem)

    # Keep >= ~8 grid steps when R allows it: enables double-buffer overlap
    # and lets the row axis shard across v7x's 2 TensorCores.
    min_blocks = 8
    if r >= min_blocks * sub:
        per_block = -(-r // min_blocks)         # ceil(r / min_blocks)
        per_block = -(-per_block // sub) * sub  # round up to sublane multiple
        tile = min(tile, per_block)

    tile = max(sub, (tile // sub) * sub)        # floor to sublane multiple
    if tile >= r:
        tile = -(-r // sub) * sub               # one (possibly masked) block
    return tile


def _xla_layernorm(x, weight, bias):
    x32 = x.astype(jnp.float32)
    mu = x32.mean(-1, keepdims=True)
    var = ((x32 - mu) ** 2).mean(-1, keepdims=True)
    y = (x32 - mu) * jax.lax.rsqrt(var + _EPS)
    y = y * weight.astype(jnp.float32) + bias.astype(jnp.float32)
    return y.astype(x.dtype)


def with_bias_layernorm(x, weight, bias, *, tile_rows=None):
    """x: (..., C); weight, bias: (C,). Same semantics as WithBias_LayerNorm."""
    orig_shape = x.shape
    c = orig_shape[-1]

    if c < 128:
        # Lane-sparse case: not worth a Pallas kernel (wasted vreg lanes,
        # masked partial stores). Plain XLA layernorm, same math / eps.
        return _xla_layernorm(x, weight, bias)

    r = math.prod(orig_shape[:-1]) if len(orig_shape) > 1 else 1
    x2 = x.reshape(r, c)
    vmem_cap = _vmem_capacity_bytes()

    if tile_rows is None:
        tile_rows = _pick_tile_rows(r, c, x2.dtype.itemsize, vmem_cap)
        if tile_rows is None:
            # Very-large-C guard: don't blow VMEM / spill, just use XLA.
            return _xla_layernorm(x, weight, bias)

    grid = (pl.cdiv(r, tile_rows),)  # masked partial last block; no host pad/slice

    w2 = weight.reshape(1, c)
    b2 = bias.reshape(1, c)

    vmem_limit = (48 << 20) if vmem_cap <= (64 << 20) else (100 << 20)

    out = pl.pallas_call(
        _layernorm_kernel,
        out_shape=jax.ShapeDtypeStruct((r, c), x.dtype),
        grid_spec=pltpu.PrefetchScalarGridSpec(
            num_scalar_prefetch=0,
            grid=grid,
            in_specs=[
                pl.BlockSpec((tile_rows, c), lambda i: (i, 0)),
                pl.BlockSpec((1, c), lambda i: (0, 0)),  # weight stays resident
                pl.BlockSpec((1, c), lambda i: (0, 0)),  # bias stays resident
            ],
            out_specs=pl.BlockSpec((tile_rows, c), lambda i: (i, 0)),
        ),
        compiler_params=pltpu.CompilerParams(
            # Independent row blocks -> shard across v7x's 2 TensorCores.
            dimension_semantics=("parallel",),
            vmem_limit_bytes=vmem_limit,
        ),
    )(x2, w2, b2)

    return out.reshape(orig_shape)


def _ref_layernorm(x, weight, bias):
    x32 = x.astype(jnp.float32)
    mu = x32.mean(-1, keepdims=True)
    sigma = ((x32 - mu) ** 2).mean(-1, keepdims=True)
    y = (x32 - mu) / jnp.sqrt(sigma + _EPS) * weight.astype(jnp.float32) + bias.astype(jnp.float32)
    return y.astype(x.dtype)


if __name__ == "__main__":
    key = jax.random.PRNGKey(0)
    k1, k2, k3, k4, k5 = jax.random.split(key, 5)

    # --- Test 1: main Pallas path (lane-dense C=128), module-default params ---
    B, S, C = 2, 16, 128
    x = jax.random.normal(k1, (B, S, C), dtype=jnp.float32)
    weight = jnp.ones((C,), dtype=jnp.float32)   # per __init__: weight = ones
    bias = jnp.zeros((C,), dtype=jnp.float32)    # per __init__: bias = zeros
    y = with_bias_layernorm(x, weight, bias)
    jax.block_until_ready(y)
    assert jnp.allclose(y, _ref_layernorm(x, weight, bias), atol=1e-4, rtol=1e-4)

    # --- Test 2: Pallas path with a partial (masked) last row block ---
    B2, S2 = 2, 19                               # R = 38, tile_rows=16 -> 3 blocks
    x2 = jax.random.normal(k2, (B2, S2, C), dtype=jnp.float32)
    w2 = jax.random.normal(k3, (C,), dtype=jnp.float32)
    b2 = jax.random.normal(k4, (C,), dtype=jnp.float32)
    y2 = with_bias_layernorm(x2, w2, b2, tile_rows=16)
    jax.block_until_ready(y2)
    assert jnp.allclose(y2, _ref_layernorm(x2, w2, b2), atol=1e-4, rtol=1e-4)

    # --- Test 3: bf16 input (sublane packing = 16), multiple full blocks ---
    x3 = jax.random.normal(k5, (4, 24, C), dtype=jnp.bfloat16)   # R = 96
    y3 = with_bias_layernorm(x3, w2, b2, tile_rows=32)           # 3 blocks
    jax.block_until_ready(y3)
    ref3 = _ref_layernorm(x3, w2, b2)
    assert jnp.allclose(y3.astype(jnp.float32), ref3.astype(jnp.float32),
                        atol=5e-2, rtol=5e-2)

    # --- Test 4: small-C fallback (original demo size C=32), same semantics ---
    x4 = jax.random.normal(k1, (2, 16, 32), dtype=jnp.float32)
    w4 = jnp.ones((32,), dtype=jnp.float32)
    b4 = jnp.zeros((32,), dtype=jnp.float32)
    y4 = with_bias_layernorm(x4, w4, b4)
    jax.block_until_ready(y4)
    assert jnp.allclose(y4, _ref_layernorm(x4, w4, b4), atol=1e-4, rtol=1e-4)

    print("KERNEL_OK")
</pallas_src>

<mosaic_0001>
module attributes {stable_mosaic.version = 11 : i64} {
  func.func @_layernorm_kernel(%arg0: i32, %arg1: memref<32x128xf32, #tpu.memory_space<vmem>>, %arg2: memref<1x128xf32, #tpu.memory_space<vmem>>, %arg3: memref<1x128xf32, #tpu.memory_space<vmem>>, %arg4: memref<32x128xf32, #tpu.memory_space<vmem>>) attributes {dimension_semantics = [#tpu.dimension_semantics<parallel>], iteration_bounds = array<i64: 1>, scalar_prefetch = 0 : i64, scratch_operands = 0 : i64, tpu.core_type = #tpu.core_type<tc>, window_params = [{transform_indices = @transform_0, window_bounds = array<i64: 32, 128>}, {pipeline_mode = #tpu.pipeline_mode<synchronous>, transform_indices = @transform_1, window_bounds = array<i64: 1, 128>}, {pipeline_mode = #tpu.pipeline_mode<synchronous>, transform_indices = @transform_2, window_bounds = array<i64: 1, 128>}, {transform_indices = @transform_3, window_bounds = array<i64: 32, 128>}]} {
    %c0 = arith.constant 0 : index
    %c0_0 = arith.constant 0 : index
    %0 = vector.load %arg1[%c0, %c0_0] : memref<32x128xf32, #tpu.memory_space<vmem>>, vector<32x128xf32>
    %cst = arith.constant dense<0.000000e+00> : vector<32xf32>
    %1 = vector.multi_reduction <add>, %0, %cst [1] : vector<32x128xf32> to vector<32xf32>
    %2 = vector.shape_cast %1 : vector<32xf32> to vector<32x1xf32>
    %cst_1 = arith.constant 1.280000e+02 : f32
    %3 = vector.broadcast %cst_1 : f32 to vector<32x1xf32>
    %4 = arith.divf %2, %3 : vector<32x1xf32>
    %5 = vector.broadcast %4 : vector<32x1xf32> to vector<32x128xf32>
    %6 = arith.subf %0, %5 : vector<32x128xf32>
    %7 = arith.mulf %6, %6 : vector<32x128xf32>
    %cst_2 = arith.constant dense<0.000000e+00> : vector<32xf32>
    %8 = vector.multi_reduction <add>, %7, %cst_2 [1] : vector<32x128xf32> to vector<32xf32>
    %9 = vector.shape_cast %8 : vector<32xf32> to vector<32x1xf32>
    %cst_3 = arith.constant 1.280000e+02 : f32
    %10 = vector.broadcast %cst_3 : f32 to vector<32x1xf32>
    %11 = arith.divf %9, %10 : vector<32x1xf32>
    %cst_4 = arith.constant 9.99999974E-6 : f32
    %12 = vector.broadcast %cst_4 : f32 to vector<32x1xf32>
    %13 = arith.addf %11, %12 : vector<32x1xf32>
    %14 = math.rsqrt %13 : vector<32x1xf32>
    %15 = vector.broadcast %14 : vector<32x1xf32> to vector<32x128xf32>
    %16 = arith.mulf %6, %15 : vector<32x128xf32>
    %c0_5 = arith.constant 0 : index
    %c0_6 = arith.constant 0 : index
    %17 = vector.load %arg2[%c0_5, %c0_6] : memref<1x128xf32, #tpu.memory_space<vmem>>, vector<1x128xf32>
    %18 = vector.broadcast %17 : vector<1x128xf32> to vector<32x128xf32>
    %19 = arith.mulf %16, %18 : vector<32x128xf32>
    %c0_7 = arith.constant 0 : index
    %c0_8 = arith.constant 0 : index
    %20 = vector.load %arg3[%c0_7, %c0_8] : memref<1x128xf32, #tpu.memory_space<vmem>>, vector<1x128xf32>
    %21 = vector.broadcast %20 : vector<1x128xf32> to vector<32x128xf32>
    %22 = arith.addf %19, %21 : vector<32x128xf32>
    %c0_9 = arith.constant 0 : index
    %c0_10 = arith.constant 0 : index
    %23 = vector.load %arg4[%c0_9, %c0_10] : memref<32x128xf32, #tpu.memory_space<vmem>>, vector<32x128xf32>
    tpu.vector_store %arg4[%c0_9, %c0_10], %22 {strides = array<i32>} : memref<32x128xf32, #tpu.memory_space<vmem>>, vector<32x128xf32>,
    return
  }
  func.func @transform_0(%arg0: i32) -> (i32, i32) {
    %c0_i32 = arith.constant 0 : i32
    %c0_i32_0 = arith.constant 0 : i32
    return %arg0, %c0_i32 : i32, i32
  }
  func.func @transform_1(%arg0: i32) -> (i32, i32) {
    %c0_i32 = arith.constant 0 : i32
    %c0_i32_0 = arith.constant 0 : i32
    %c0_i32_1 = arith.constant 0 : i32
    return %c0_i32, %c0_i32_0 : i32, i32
  }
  func.func @transform_2(%arg0: i32) -> (i32, i32) {
    %c0_i32 = arith.constant 0 : i32
    %c0_i32_0 = arith.constant 0 : i32
    %c0_i32_1 = arith.constant 0 : i32
    return %c0_i32, %c0_i32_0 : i32, i32
  }
  func.func @transform_3(%arg0: i32) -> (i32, i32) {
    %c0_i32 = arith.constant 0 : i32
    %c0_i32_0 = arith.constant 0 : i32
    return %arg0, %c0_i32 : i32, i32
  }
}

</mosaic_0001>

<bundles_post_ra>
// kernel: tpu_custom_call.1
= control target key start
LH: loop header
LB: loop body
LE: loop exit
PB: predicated region body
PF: predicated region fallthrough
CT: control target
= control target key end

     0   :  { %8 = vsyncpa [#allocation3], 0  ;;  %s326_s0 = inlined_call_operand.hbm [shape: f32[32,128], index: 0, kind: input, shape index: {}]   ;;  %s327_s1 = inlined_call_operand.hbm [shape: f32[1,128], index: 1, kind: input, shape index: {}]   ;;  %s328_s2 = inlined_call_operand.vmem [shape: f32[1,128], index: 2, kind: input, shape index: {}]   ;;  %s329_s3 = inlined_call_operand.hbm [shape: f32[32,128], index: 3, kind: output, shape index: {}]  }
   0x1   :  { %9 = vsyncpa [#allocation6], 0 }
   0x2   :  { %10 = vsyncpa [#allocation4], 0  ;;  %s15_s14 = sshll.u32 %s326_s0, 4  ;;  %s272_s15 = smov [#allocation2]   ;;  %s16_s14 = int_to_ptr.hbm [resolvable:$true] %s15_s14 }
   0x3   :  { %s17_s16 = sshll.u32 %s272_s15, 4  ;;  %s29_s19 = sshll.u32 %s327_s1, 4  ;;  %s18_s16 = int_to_ptr.vmem [resolvable:$true] %s17_s16  ;;  %s30_s19 = int_to_ptr.hbm [resolvable:$true] %s29_s19 }
   0x4   :  { %s273_s20 = smov 128   ;;  %s274_s21 = smov 8  }
   0x5   :  { %23 = dma.hbm_to_vmem [thread:$0]  %s16_s14, 512, %s18_s16, [#allocation3], %s273_s20, %s273_s20, %s274_s21  }
   0x6   :  { %s275_s22 = smov [#allocation5]  }
   0x7   :  { %s31_s23 = sshll.u32 %s275_s22, 4  ;;  %s32_s23 = int_to_ptr.vmem [resolvable:$true] %s31_s23 }
   0x8   :  { %34 = dma.hbm_to_vmem [thread:$0]  %s30_s19, 16, %s32_s23, [#allocation6]  }
   0x9   :  { %266 = dma.done.wait [#allocation3], 512  }
   0xa   :  { %267 = vsyncadd [#allocation3], 4294966784 }
   0xb   :  { %268 = dma.done.wait [#allocation6], 16  }
   0xc   :  { %269 = vsyncadd [#allocation6], 4294967280  ;;  %v47_v0 = vld [vmem:[#allocation2 + $0x10] sm:$0xff]  ;;  %v45_v1 = vld [vmem:[#allocation2] sm:$0xff]  ;;  %v276_v4 = vmov 128.0   ;;  %s162_s27 = sshll.u32 %s329_s3, 4  ;;  %s163_s27 = int_to_ptr.hbm [resolvable:$true] %s162_s27 }
   0xd   :  { %53 = vadd.xlane.f32.xlu1 %v47_v0  ;;  %49 = vadd.xlane.f32.xlu0 %v45_v1  ;;  %v48_v2 = vld [vmem:[#allocation2 + $0x18] sm:$0xff]  ;;  %v46_v3 = vld [vmem:[#allocation2 + $0x8] sm:$0xff]  ;;  %184 = vrcp.f32 %v276_v4  ;;  %v182_v53 = vld [vmem:[#allocation5] ss:$0 sm:$0xff] }
   0xe   :  { %v183_v61 = vld [vmem:[%s328_s2] ss:$0 sm:$0xff]  ;;  %s277_s2 = smov [#allocation7]  }
   0xf   :  { %s160_s24 = sshll.u32 %s277_s2, 4  ;;  %s161_s24 = int_to_ptr.vmem [resolvable:$true] %s160_s24 }
  0x13   :  { %v185_v5 = vpop.eup %184 }
  0x14   :  { %v58_v6 = vmul.f32 128.0, %v185_v5  ;;  %vm62_vm0 = vweird.f32 %v185_v5 }
  0x15   :  { %55 = vadd.xlane.f32.xlu1 %v48_v2  ;;  %51 = vadd.xlane.f32.xlu0 %v46_v3 }
  0x16   :  { %v59_v7 = vsub.f32 1.0, %v58_v6 }
  0x18   :  { %v60_v8 = vmul.f32 %v185_v5, %v59_v7 }
  0x1a   :  { %v61_v9 = vadd.f32 %v185_v5, %v60_v8 }
  0x1c   :  { %v63_v10 = vsel %vm62_vm0, %v185_v5, %v61_v9 }
  0x80   :  { %v54_v11 = vpop.xlane.xlu1 %53  ;;  %v50_v12 = vpop.xlane.xlu0 %49 }
  0x81   :  { %v66_v13 = vmul.f32 %v63_v10, %v54_v11  ;;  %v64_v14 = vmul.f32 %v63_v10, %v50_v12 }
  0x83   :  { %v70_v15 = vsub.f32 %v47_v0, %v66_v13  ;;  %v68_v16 = vsub.f32 %v45_v1, %v64_v14 }
  0x85   :  { %v74_v17 = vmul.f32 %v70_v15, %v70_v15  ;;  %v72_v18 = vmul.f32 %v68_v16, %v68_v16 }
  0x87   :  { %80 = vadd.xlane.f32.xlu0 %v74_v17  ;;  %76 = vadd.xlane.f32.xlu2 %v72_v18 }
  0x88   :  { %v56_v19 = vpop.xlane.xlu1 %55  ;;  %v52_v20 = vpop.xlane.xlu0 %51 }
  0x89   :  { %v67_v21 = vmul.f32 %v63_v10, %v56_v19  ;;  %v65_v22 = vmul.f32 %v63_v10, %v52_v20 }
  0x8b   :  { %v307_v23 = vsub.f32 %v48_v2, %v67_v21  ;;  %v309_v24 = vsub.f32 %v46_v3, %v65_v22 }
  0x8d   :  { %v75_v25 = vmul.f32 %v307_v23, %v307_v23  ;;  %v73_v26 = vmul.f32 %v309_v24, %v309_v24 }
  0x8f   :  { %82 = vadd.xlane.f32.xlu1 %v75_v25  ;;  %78 = vadd.xlane.f32.xlu2 %v73_v26 }
  0xfa   :  { %v77_v27 = vpop.xlane.xlu2 %76  ;;  %v81_v28 = vpop.xlane.xlu0 %80 }
  0xfb   :  { %v84_v29 = vmul.f32 %v77_v27, %v63_v10  ;;  %v86_v30 = vmul.f32 %v81_v28, %v63_v10 }
  0xfd   :  { %v88_v31 = vadd.f32 1e-05, %v84_v29  ;;  %v90_v32 = vadd.f32 1e-05, %v86_v30 }
  0xff   :  { %186 = vrsqrt.f32 %v88_v31  ;;  %vm98_vm3 = vweird.f32 %v88_v31  ;;  %vm118_vm5 = vweird.f32 %v90_v32 }
 0x100   :  { %188 = vrsqrt.f32 %v90_v32 }
 0x102   :  { %v83_v33 = vpop.xlane.xlu1 %82  ;;  %v79_v34 = vpop.xlane.xlu2 %78 }
 0x103   :  { %v87_v35 = vmul.f32 %v83_v33, %v63_v10  ;;  %v85_v36 = vmul.f32 %v79_v34, %v63_v10 }
 0x105   :  { %v187_v37 = vpop.eup %186  ;;  %v91_v38 = vadd.f32 1e-05, %v87_v35  ;;  %v89_v39 = vadd.f32 1e-05, %v85_v36 }
 0x106   :  { %v189_v40 = vpop.eup %188  ;;  %v93_v41 = vmul.f32 %v187_v37, %v88_v31  ;;  %vm99_vm1 = vweird.f32 %v187_v37 }
 0x107   :  { %v113_v42 = vmul.f32 %v189_v40, %v90_v32  ;;  %190 = vrsqrt.f32 %v91_v38  ;;  %vm119_vm2 = vweird.f32 %v189_v40  ;;  %vm100_vm4 = vmor %vm98_vm3, %vm99_vm1  ;;  %vm128_vm9 = vweird.f32 %v91_v38 }
 0x108   :  { %v94_v43 = vmul.f32 %v187_v37, %v93_v41  ;;  %192 = vrsqrt.f32 %v89_v39  ;;  %vm120_vm6 = vmor %vm118_vm5, %vm119_vm2  ;;  %vm108_vm11 = vweird.f32 %v89_v39 }
 0x109   :  { %v114_v44 = vmul.f32 %v189_v40, %v113_v42 }
 0x10a   :  { %v95_v45 = vmul.f32 0.5, %v94_v43 }
 0x10b   :  { %v115_v46 = vmul.f32 0.5, %v114_v44 }
 0x10c   :  { %v96_v47 = vsub.f32 1.5, %v95_v45 }
 0x10d   :  { %v191_v48 = vpop.eup %190  ;;  %v116_v49 = vsub.f32 1.5, %v115_v46 }
 0x10e   :  { %v193_v50 = vpop.eup %192  ;;  %v97_v51 = vmul.f32 %v187_v37, %v96_v47  ;;  %v123_v52 = vmul.f32 %v191_v48, %v91_v38  ;;  %vm129_vm7 = vweird.f32 %v191_v48 }
 0x10f   :  { %v117_v54 = vmul.f32 %v189_v40, %v116_v49  ;;  %v103_v55 = vmul.f32 %v193_v50, %v89_v39  ;;  %vm109_vm8 = vweird.f32 %v193_v50  ;;  %vm130_vm10 = vmor %vm128_vm9, %vm129_vm7 }
 0x110   :  { %v101_v56 = vsel %vm100_vm4, %v187_v37, %v97_v51  ;;  %v124_v57 = vmul.f32 %v191_v48, %v123_v52  ;;  %vm110_vm12 = vmor %vm108_vm11, %vm109_vm8 }
 0x111   :  { %v132_v58 = vmul.f32 %v101_v56, %v68_v16  ;;  %v121_v59 = vsel %vm120_vm6, %v189_v40, %v117_v54  ;;  %v104_v60 = vmul.f32 %v193_v50, %v103_v55 }
 0x112   :  { %v134_v62 = vmul.f32 %v121_v59, %v70_v15  ;;  %v125_v63 = vmul.f32 0.5, %v124_v57 }
 0x113   :  { %v140_v0 = vmul.f32 %v182_v53, %v132_v58  ;;  %v105_v1 = vmul.f32 0.5, %v104_v60 }
 0x114   :  { %v142_v2 = vmul.f32 %v182_v53, %v134_v62  ;;  %v126_v3 = vsub.f32 1.5, %v125_v63 }
 0x115   :  { %v106_v4 = vsub.f32 1.5, %v105_v1  ;;  %v148_v5 = vadd.f32 %v183_v61, %v140_v0 }
 0x116   :  { %v127_v6 = vmul.f32 %v191_v48, %v126_v3  ;;  %v150_v7 = vadd.f32 %v183_v61, %v142_v2 }
 0x117   :  { %v107_v8 = vmul.f32 %v193_v50, %v106_v4  ;;  %152 = vst [vmem:[#allocation7] sm:$0xff] %v148_v5 }
 0x118   :  { %v131_v9 = vsel %vm130_vm10, %v191_v48, %v127_v6  ;;  %154 = vst [vmem:[#allocation7 + $0x10] sm:$0xff] %v150_v7 }
 0x119   :  { %v135_v10 = vmul.f32 %v131_v9, %v307_v23  ;;  %v111_v11 = vsel %vm110_vm12, %v193_v50, %v107_v8 }
 0x11a   :  { %v133_v12 = vmul.f32 %v111_v11, %v309_v24 }
 0x11b   :  { %v143_v13 = vmul.f32 %v182_v53, %v135_v10 }
 0x11c   :  { %v141_v14 = vmul.f32 %v182_v53, %v133_v12 }
 0x11d   :  { %v151_v15 = vadd.f32 %v183_v61, %v143_v13 }
 0x11e   :  { %v149_v16 = vadd.f32 %v183_v61, %v141_v14 }
 0x11f   :  { %155 = vst [vmem:[#allocation7 + $0x18] sm:$0xff] %v151_v15 }
 0x120   :  { %153 = vst [vmem:[#allocation7 + $0x8] sm:$0xff] %v149_v16 }
 0x121   :  { %168 = dma.vmem_to_hbm [thread:$0]  %s161_s24, 512, %s163_s27, [#allocation4], %s273_s20, %s273_s20, %s274_s21  }
 0x122   :  { %270 = dma.done.wait [#allocation4], 512  }
 0x123   :  { %271 = vsyncadd [#allocation4], 4294966784 }
 0x124   :  { %173 = vsyncpa [#allocation3], 1 }
 0x125   :  { %174 = vsyncpa [#allocation6], 1 }
 0x126   :  { %175 = vsyncpa [#allocation4], 1 }

</bundles_post_ra>
